<compile_context>
chip_gen: v6e
topology: v6e:2x2x1
jax: 0.10.0
libtpu: 0.0.40
codegen_flags: <defaults>
</compile_context>

<pallas_src>
import functools

import jax
import jax.numpy as jnp
from jax.experimental import pallas as pl
from jax.experimental.pallas import tpu as pltpu


# dot_general dimension numbers for A @ B^T (same pattern as flash-attention q @ k^T).
_TRANS_B = (((1,), (1,)), ((), ()))


def _round_up(v, m):
    return (v + m - 1) // m * m


def _cdiv(a, b):
    return (a + b - 1) // b


def _scores_kernel(x_ref, wvu_ref, w_ref, s_ref, *, hp, precision):
    """Per-tile gated attention scores.

    x_ref  : (TILE_N, D)   compute dtype (bf16 fast path / f32 parity path)
    wvu_ref: (D, 2*Hp)     fused [Wv | Wu], each half zero-padded to Hp lanes
    w_ref  : (8, Hp)       row 0 holds w, rows 1..7 and pad lanes are zero (f32)
    s_ref  : (1, TILE_N)   lane-dense raw attention scores (f32)
    """
    # One fused MXU matmul for both gate projections; f32 accumulation.
    g = jnp.dot(x_ref[...], wvu_ref[...],
                preferred_element_type=jnp.float32, precision=precision)

    # Aligned 128-lane halves; tanh/sigmoid go to the EUP (hidden under the x DMA).
    vh = jnp.tanh(g[:, :hp])          # (TILE_N, Hp)
    uh = jax.nn.sigmoid(g[:, hp:])    # (TILE_N, Hp)
    gated = vh * uh                   # pad lanes are exactly 0 (0 * sigmoid(0))

    # scores = w . gated^T : tiny matmul whose output is already lane-dense (TILE_N on
    # the lane axis) so the store below is a full-width vst.  Contracting on the RHS
    # minor dim is the q@k^T pattern -> transposed-RHS MXU push, no per-tile XLU
    # transpose of the (TILE_N, Hp) gated block.  Zero rows / pad lanes of w contribute
    # nothing.
    s8 = jax.lax.dot_general(
        w_ref[...], gated, dimension_numbers=_TRANS_B,
        preferred_element_type=jnp.float32, precision=precision)   # (8, TILE_N)
    s_ref[...] = s8[0:1, :]                                        # (1, TILE_N)


def _softmax_kernel(s_ref, o_ref, *, n_valid, row_len):
    """Masked softmax over all entries of the (R, W) score block.

    Element (r, c) corresponds to instance index r*row_len + c; indices >= n_valid are
    padding (boundary-tile garbage rows) and are masked to -inf / 0 so they cannot
    pollute the max or the denominator.
    """
    s = s_ref[...]                                                   # (R, W) f32
    row = jax.lax.broadcasted_iota(jnp.int32, s.shape, 0)
    col = jax.lax.broadcasted_iota(jnp.int32, s.shape, 1)
    valid = (row * row_len + col) < n_valid
    s = jnp.where(valid, s, -jnp.inf)                                # mask pad entries
    m = jnp.max(s, axis=1, keepdims=True)                            # (R, 1)
    m = jnp.max(m, axis=0, keepdims=True)                            # (1, 1)
    e = jnp.where(valid, jnp.exp(s - m), 0.0)
    denom = jnp.sum(jnp.sum(e, axis=1, keepdims=True), axis=0, keepdims=True)
    o_ref[...] = e / denom


def prepare_gated_attention_weights(wv, wu, ww, *, compute_dtype=jnp.bfloat16):
    """One-time weight prep (hoist out of the per-forward path).

    Fuses [Wv | Wu] into a single (D, 2*Hp) matrix in `compute_dtype` (bf16 by default:
    the deliberate MXU fast path) with each half zero-padded to Hp = 128-lane groups,
    and embeds w into row 0 of an (8, Hp) f32 matrix.
    """
    d, h = wv.shape
    hp = _round_up(max(h, 128), 128)
    wvu = jnp.zeros((d, 2 * hp), dtype=compute_dtype)
    wvu = wvu.at[:, :h].set(wv.astype(compute_dtype))
    wvu = wvu.at[:, hp:hp + h].set(wu.astype(compute_dtype))
    w_mat = jnp.zeros((8, hp), dtype=jnp.float32)
    w_mat = w_mat.at[0, :h].set(ww[:, 0].astype(jnp.float32))
    return wvu, w_mat


def gated_attention_apply(x, wvu, w_mat, *, tile_n=2048,
                          vmem_limit_bytes=48 * 1024 * 1024, precision=None):
    """x: (N, D); wvu/w_mat from prepare_gated_attention_weights. Returns (N,) weights.

    Per-generation knobs:
      * v5e / v6e (128 MiB VMEM): tile_n 2048-4096, vmem_limit_bytes 64-96 MiB.
      * v7x (64 MiB VMEM): keep vmem_limit_bytes <= ~48 MiB; tile_n is auto-clamped so
        2 x-tile buffers + resident weights + f32 temps fit with ~2 MiB slack.
    Best practice is to hand in x already in the compute dtype (bf16) so the cast fuses
    with the upstream producer; otherwise it is cast here.
    """
    n, d = x.shape
    hp = w_mat.shape[1]
    compute_dtype = wvu.dtype
    if x.dtype != compute_dtype:
        x = x.astype(compute_dtype)

    # ---- VMEM budget -> clamp tile_n (matters most on v7x's 64 MiB) -----------------
    itemsize = jnp.dtype(compute_dtype).itemsize
    weight_bytes = wvu.size * itemsize + w_mat.size * 4
    row_bytes = 2 * d * itemsize + 2 * (2 * hp) * 4   # 2 x-tile buffers + f32 temps
    budget = vmem_limit_bytes - weight_bytes - (2 << 20)
    if budget > 0:
        max_tile = max(128, (budget // row_bytes) // 128 * 128)
        tile_n = min(tile_n, max_tile)

    # ---- instance-axis tiling (no jnp.pad of x: boundary block rows are masked) -----
    if n <= tile_n:
        if n >= 1024:
            # >=2 tiles so "parallel" semantics can shard the bag across both v7x TCs.
            tile_n = _round_up(_cdiv(n, 2), 128)
        else:
            tile_n = n                    # full-dim block: always layout-legal
    else:
        tile_n = _round_up(tile_n, 128)
    num_tiles = _cdiv(n, tile_n)
    n_tot = num_tiles * tile_n

    # ---- pass 1: stream x once, produce lane-dense raw scores (1, N_tot) ------------
    kernel = functools.partial(_scores_kernel, hp=hp, precision=precision)

    def scores_call(weight_mode):
        wkw = {} if weight_mode is None else {"pipeline_mode": weight_mode}
        return pl.pallas_call(
            kernel,
            out_shape=jax.ShapeDtypeStruct((1, n_tot), jnp.float32),
            grid=(num_tiles,),
            in_specs=[
                pl.BlockSpec((tile_n, d), lambda i: (i, 0)),          # x (pipelined)
                pl.BlockSpec((d, 2 * hp), lambda i: (0, 0), **wkw),   # fused weights
                pl.BlockSpec((8, hp), lambda i: (0, 0), **wkw),       # w row
            ],
            out_specs=pl.BlockSpec((1, tile_n), lambda i: (0, i)),
            compiler_params=pltpu.CompilerParams(
                dimension_semantics=("parallel",),   # megacore / v7x dual-TC sharding
                vmem_limit_bytes=vmem_limit_bytes,
            ),
        )(x, wvu, w_mat)

    try:
        # Constant index_map => never re-fetched; single-buffer to halve weight VMEM.
        scores = scores_call(pl.Buffered(1))
    except Exception:
        # Fallback for JAX builds without per-spec pipeline_mode support.
        scores = scores_call(None)

    # ---- pass 2: masked softmax over the tiny score slab ----------------------------
    if n_tot % 8 == 0:
        rows, w_len = 8, n_tot // 8       # sublane-dense: 8x fewer vregs in the reduce
    else:
        rows, w_len = 1, n_tot
    attn = pl.pallas_call(
        functools.partial(_softmax_kernel, n_valid=n, row_len=w_len),
        out_shape=jax.ShapeDtypeStruct((rows, w_len), jnp.float32),
        in_specs=[pl.BlockSpec(memory_space=pltpu.MemorySpace.VMEM)],
        out_specs=pl.BlockSpec(memory_space=pltpu.MemorySpace.VMEM),
    )(scores.reshape(rows, w_len))

    return attn.reshape(-1)[:n]


def gated_attention_layer(x, wv, wu, ww, *, compute_dtype=jnp.bfloat16,
                          tile_n=2048, vmem_limit_bytes=48 * 1024 * 1024,
                          precision=None):
    """Convenience wrapper: weight prep + apply. Prefer hoisting the prep out."""
    wvu, w_mat = prepare_gated_attention_weights(wv, wu, ww, compute_dtype=compute_dtype)
    return gated_attention_apply(x, wvu, w_mat, tile_n=tile_n,
                                 vmem_limit_bytes=vmem_limit_bytes, precision=precision)


def gated_attention_ref(x, wv, wu, ww):
    """Pure-JAX reference matching the PyTorch forward (f32)."""
    vh = jnp.tanh(x @ wv)
    uh = jax.nn.sigmoid(x @ wu)
    scores = ((vh * uh) @ ww)[:, 0]
    return jax.nn.softmax(scores[None, :], axis=1)[0]


if __name__ == "__main__":
    key = jax.random.PRNGKey(0)

    # hidden_dim=10 matches the module default.
    N, D, H = 8, 32, 10
    kx, kv, ku, kw = jax.random.split(key, 4)
    x = jax.random.normal(kx, (N, D), dtype=jnp.float32)
    wv = jax.random.normal(kv, (D, H), dtype=jnp.float32) * (1.0 / jnp.sqrt(D))
    wu = jax.random.normal(ku, (D, H), dtype=jnp.float32) * (1.0 / jnp.sqrt(D))
    ww = jax.random.normal(kw, (H, 1), dtype=jnp.float32) * (1.0 / jnp.sqrt(H))

    # Hoisted one-time weight prep (bf16 MXU fast path), reused across forwards.
    wvu_bf16, w_mat = prepare_gated_attention_weights(wv, wu, ww)

    # Case 1: tiny bag, single-tile path, bf16 feed.
    attn = jax.block_until_ready(gated_attention_apply(x, wvu_bf16, w_mat))
    ref = gated_attention_ref(x, wv, wu, ww)
    assert attn.shape == (N,)
    assert jnp.allclose(attn, ref, atol=1e-2, rtol=5e-2), (attn, ref)
    assert jnp.allclose(jnp.sum(attn), 1.0, atol=1e-5)

    # Case 2: ragged bag (N not tile-aligned) on the gridded path -- exercises the
    # no-pad boundary block + masked softmax (3 tiles of 128, last tile 44 valid rows).
    N2 = 300
    x2 = jax.random.normal(jax.random.fold_in(key, 1), (N2, D), dtype=jnp.float32)
    attn2 = jax.block_until_ready(
        gated_attention_apply(x2, wvu_bf16, w_mat, tile_n=128))
    ref2 = gated_attention_ref(x2, wv, wu, ww)
    assert attn2.shape == (N2,)
    assert jnp.allclose(attn2, ref2, atol=2e-3, rtol=5e-2), (attn2, ref2)
    assert jnp.allclose(jnp.sum(attn2), 1.0, atol=1e-5)

    # Case 3: f32 parity path (compute_dtype=float32) with tight tolerance.
    attn3 = jax.block_until_ready(
        gated_attention_layer(x2, wv, wu, ww, compute_dtype=jnp.float32, tile_n=128))
    assert attn3.shape == (N2,)
    assert jnp.allclose(attn3, ref2, atol=2e-5, rtol=1e-4), (attn3, ref2)
    assert jnp.allclose(jnp.sum(attn3), 1.0, atol=1e-5)

    print("KERNEL_OK")
</pallas_src>

<mosaic_0001>
module attributes {stable_mosaic.version = 11 : i64} {
  func.func @_scores_kernel(%arg0: i32, %arg1: memref<8x32xbf16, #tpu.memory_space<vmem>>, %arg2: memref<32x256xbf16, #tpu.memory_space<vmem>>, %arg3: memref<8x128xf32, #tpu.memory_space<vmem>>, %arg4: memref<1x8xf32, #tpu.memory_space<vmem>>) attributes {dimension_semantics = [#tpu.dimension_semantics<parallel>], iteration_bounds = array<i64: 1>, scalar_prefetch = 0 : i64, scratch_operands = 0 : i64, tpu.core_type = #tpu.core_type<tc>, window_params = [{transform_indices = @transform_0, window_bounds = array<i64: 8, 32>}, {pipeline_mode = #tpu.pipeline_mode<synchronous>, transform_indices = @transform_1, window_bounds = array<i64: 32, 256>}, {pipeline_mode = #tpu.pipeline_mode<synchronous>, transform_indices = @transform_2, window_bounds = array<i64: 8, 128>}, {transform_indices = @transform_3, window_bounds = array<i64: 1, 8>}]} {
    %c0 = arith.constant 0 : index
    %c0_0 = arith.constant 0 : index
    %0 = vector.load %arg1[%c0, %c0_0] : memref<8x32xbf16, #tpu.memory_space<vmem>>, vector<8x32xbf16>
    %c0_1 = arith.constant 0 : index
    %c0_2 = arith.constant 0 : index
    %1 = vector.load %arg2[%c0_1, %c0_2] : memref<32x256xbf16, #tpu.memory_space<vmem>>, vector<32x256xbf16>
    %cst = arith.constant dense<0.000000e+00> : vector<8x256xf32>
    %2 = tpu.matmul %0, %1, %cst {dimension_numbers = #tpu.dot_dimension_numbers<[1], [0], [0], [1], [0, 0, 1, 1], [], []>} : vector<8x32xbf16>, vector<32x256xbf16>, vector<8x256xf32> -> vector<8x256xf32>
    %3 = vector.extract_strided_slice %2 {offsets = [0, 0], sizes = [8, 128], strides = [1, 1]} : vector<8x256xf32> to vector<8x128xf32>
    %4 = math.tanh %3 : vector<8x128xf32>
    %5 = vector.extract_strided_slice %2 {offsets = [0, 128], sizes = [8, 128], strides = [1, 1]} : vector<8x256xf32> to vector<8x128xf32>
    %6 = arith.negf %5 : vector<8x128xf32>
    %7 = math.exp %6 : vector<8x128xf32>
    %cst_3 = arith.constant 1.000000e+00 : f32
    %8 = vector.broadcast %cst_3 : f32 to vector<8x128xf32>
    %9 = arith.addf %8, %7 : vector<8x128xf32>
    %10 = arith.divf %8, %9 : vector<8x128xf32>
    %11 = arith.mulf %4, %10 : vector<8x128xf32>
    %c0_4 = arith.constant 0 : index
    %c0_5 = arith.constant 0 : index
    %12 = vector.load %arg3[%c0_4, %c0_5] : memref<8x128xf32, #tpu.memory_space<vmem>>, vector<8x128xf32>
    %cst_6 = arith.constant dense<0.000000e+00> : vector<8x8xf32>
    %13 = tpu.matmul %12, %11, %cst_6 {dimension_numbers = #tpu.dot_dimension_numbers<[1], [1], [0], [0], [0, 0, 1, 0], [], []>} : vector<8x128xf32>, vector<8x128xf32>, vector<8x8xf32> -> vector<8x8xf32>
    %14 = vector.extract_strided_slice %13 {offsets = [0, 0], sizes = [1, 8], strides = [1, 1]} : vector<8x8xf32> to vector<1x8xf32>
    %c0_7 = arith.constant 0 : index
    %c0_8 = arith.constant 0 : index
    %15 = vector.load %arg4[%c0_7, %c0_8] : memref<1x8xf32, #tpu.memory_space<vmem>>, vector<1x8xf32>
    tpu.vector_store %arg4[%c0_7, %c0_8], %14 {strides = array<i32>} : memref<1x8xf32, #tpu.memory_space<vmem>>, vector<1x8xf32>,
    return
  }
  func.func @transform_0(%arg0: i32) -> (i32, i32) {
    %c0_i32 = arith.constant 0 : i32
    %c0_i32_0 = arith.constant 0 : i32
    return %arg0, %c0_i32 : i32, i32
  }
  func.func @transform_1(%arg0: i32) -> (i32, i32) {
    %c0_i32 = arith.constant 0 : i32
    %c0_i32_0 = arith.constant 0 : i32
    %c0_i32_1 = arith.constant 0 : i32
    return %c0_i32, %c0_i32_0 : i32, i32
  }
  func.func @transform_2(%arg0: i32) -> (i32, i32) {
    %c0_i32 = arith.constant 0 : i32
    %c0_i32_0 = arith.constant 0 : i32
    %c0_i32_1 = arith.constant 0 : i32
    return %c0_i32, %c0_i32_0 : i32, i32
  }
  func.func @transform_3(%arg0: i32) -> (i32, i32) {
    %c0_i32 = arith.constant 0 : i32
    %c0_i32_0 = arith.constant 0 : i32
    return %c0_i32, %arg0 : i32, i32
  }
}

module attributes {stable_mosaic.version = 11 : i64} {
  func.func @_scores_kernel(%arg0: i32, %arg1: memref<8x32xbf16, #tpu.memory_space<vmem>>, %arg2: memref<32x256xbf16, #tpu.memory_space<vmem>>, %arg3: memref<8x128xf32, #tpu.memory_space<vmem>>, %arg4: memref<1x8xf32, #tpu.memory_space<vmem>>) attributes {dimension_semantics = [#tpu.dimension_semantics<parallel>], iteration_bounds = array<i64: 1>, scalar_prefetch = 0 : i64, scratch_operands = 0 : i64, tpu.core_type = #tpu.core_type<tc>, window_params = [{transform_indices = @transform_0, window_bounds = array<i64: 8, 32>}, {pipeline_mode = #tpu.pipeline_mode<synchronous>, transform_indices = @transform_1, window_bounds = array<i64: 32, 256>}, {pipeline_mode = #tpu.pipeline_mode<synchronous>, transform_indices = @transform_2, window_bounds = array<i64: 8, 128>}, {transform_indices = @transform_3, window_bounds = array<i64: 1, 8>}]} {
    %c0 = arith.constant 0 : index
    %c0_0 = arith.constant 0 : index
    %0 = vector.load %arg1[%c0, %c0_0] : memref<8x32xbf16, #tpu.memory_space<vmem>>, vector<8x32xbf16>
    %c0_1 = arith.constant 0 : index
    %c0_2 = arith.constant 0 : index
    %1 = vector.load %arg2[%c0_1, %c0_2] : memref<32x256xbf16, #tpu.memory_space<vmem>>, vector<32x256xbf16>
    %cst = arith.constant dense<0.000000e+00> : vector<8x256xf32>
    %2 = tpu.matmul %0, %1, %cst {dimension_numbers = #tpu.dot_dimension_numbers<[1], [0], [0], [1], [0, 0, 1, 1], [], []>} : vector<8x32xbf16>, vector<32x256xbf16>, vector<8x256xf32> -> vector<8x256xf32>
    %3 = vector.extract_strided_slice %2 {offsets = [0, 0], sizes = [8, 128], strides = [1, 1]} : vector<8x256xf32> to vector<8x128xf32>
    %4 = math.tanh %3 : vector<8x128xf32>
    %5 = vector.extract_strided_slice %2 {offsets = [0, 128], sizes = [8, 128], strides = [1, 1]} : vector<8x256xf32> to vector<8x128xf32>
    %6 = arith.negf %5 : vector<8x128xf32>
    %7 = math.exp %6 : vector<8x128xf32>
    %cst_3 = arith.constant 1.000000e+00 : f32
    %8 = vector.broadcast %cst_3 : f32 to vector<8x128xf32>
    %9 = arith.addf %8, %7 : vector<8x128xf32>
    %10 = arith.divf %8, %9 : vector<8x128xf32>
    %11 = arith.mulf %4, %10 : vector<8x128xf32>
    %c0_4 = arith.constant 0 : index
    %c0_5 = arith.constant 0 : index
    %12 = vector.load %arg3[%c0_4, %c0_5] : memref<8x128xf32, #tpu.memory_space<vmem>>, vector<8x128xf32>
    %cst_6 = arith.constant dense<0.000000e+00> : vector<8x8xf32>
    %13 = tpu.matmul %12, %11, %cst_6 {dimension_numbers = #tpu.dot_dimension_numbers<[1], [1], [0], [0], [0, 0, 1, 0], [], []>} : vector<8x128xf32>, vector<8x128xf32>, vector<8x8xf32> -> vector<8x8xf32>
    %14 = vector.extract_strided_slice %13 {offsets = [0, 0], sizes = [1, 8], strides = [1, 1]} : vector<8x8xf32> to vector<1x8xf32>
    %c0_7 = arith.constant 0 : index
    %c0_8 = arith.constant 0 : index
    %15 = vector.load %arg4[%c0_7, %c0_8] : memref<1x8xf32, #tpu.memory_space<vmem>>, vector<1x8xf32>
    tpu.vector_store %arg4[%c0_7, %c0_8], %14 {strides = array<i32>} : memref<1x8xf32, #tpu.memory_space<vmem>>, vector<1x8xf32>,
    return
  }
  func.func @transform_0(%arg0: i32) -> (i32, i32) {
    %c0_i32 = arith.constant 0 : i32
    %c0_i32_0 = arith.constant 0 : i32
    return %arg0, %c0_i32 : i32, i32
  }
  func.func @transform_1(%arg0: i32) -> (i32, i32) {
    %c0_i32 = arith.constant 0 : i32
    %c0_i32_0 = arith.constant 0 : i32
    %c0_i32_1 = arith.constant 0 : i32
    return %c0_i32, %c0_i32_0 : i32, i32
  }
  func.func @transform_2(%arg0: i32) -> (i32, i32) {
    %c0_i32 = arith.constant 0 : i32
    %c0_i32_0 = arith.constant 0 : i32
    %c0_i32_1 = arith.constant 0 : i32
    return %c0_i32, %c0_i32_0 : i32, i32
  }
  func.func @transform_3(%arg0: i32) -> (i32, i32) {
    %c0_i32 = arith.constant 0 : i32
    %c0_i32_0 = arith.constant 0 : i32
    return %c0_i32, %arg0 : i32, i32
  }
}

</mosaic_0001>

<bundles_post_ra>
// kernel: tpu_custom_call.1
= control target key start
LH: loop header
LB: loop body
LE: loop exit
PB: predicated region body
PF: predicated region fallthrough
CT: control target
= control target key end

     0   :  { %8 = vsyncpa [#allocation3], 0  ;;  %s381_s0 = inlined_call_operand.hbm [shape: bf16[8,32], index: 0, kind: input, shape index: {}]   ;;  %s382_s1 = inlined_call_operand.hbm [shape: bf16[32,256], index: 1, kind: input, shape index: {}]   ;;  %s383_s2 = inlined_call_operand.hbm [shape: f32[8,128], index: 2, kind: input, shape index: {}]   ;;  %s384_s3 = inlined_call_operand.hbm [shape: f32[1,8], index: 3, kind: output, shape index: {}]  }
   0x1   :  { %9 = vsyncpa [#allocation6], 0 }
   0x2   :  { %10 = vsyncpa [#allocation4], 0  ;;  %s340_s12 = smov [#allocation5]  }
   0x3   :  { %s26_s13 = sshll.u32 %s340_s12, 4  ;;  %s27_s13 = int_to_ptr.vmem [resolvable:$true] %s26_s13 }
   0x4   :  { %s262_s14 = scalar_lea.vmem %s27_s13, 512  ;;  %p267_p1 = scmp.lt.s32.totalorder %s27_s13, %s27_s13 }
   0x5   :  { %p263_p0 = scmp.ne.s32.totalorder %s27_s13, %s262_s14  ;;  %p268_p2 = scmp.lt.s32.totalorder %s262_s14, %s262_s14 }
   0x7   :  { %p269_p3 = por %p268_p2, %p267_p1 }
   0x9   :  { %p270_p4 = pnand %p269_p3, %p263_p0 }
   0xb   :  { %273 = shalt.err (!%p270_p4)
}
   0xc   :  { %s341_s15 = smov 128   ;;  %s342_s16 = smov 8  }
   0xd   :  { %32 = dma.hbm_to_vmem [thread:$0]  %s382_s1, 512, %s27_s13, [#allocation6], %s341_s15, %s341_s15, %s342_s16  }
   0xe   :  { %s343_s19 = smov [#allocation2]   ;;  %s344_s21 = smov [#allocation7]  }
   0xf   :  { %s17_s20 = sshll.u32 %s343_s19, 4  ;;  %s39_s22 = sshll.u32 %s344_s21, 4  ;;  %s18_s20 = int_to_ptr.vmem [resolvable:$true] %s17_s20  ;;  %s40_s22 = int_to_ptr.vmem [resolvable:$true] %s39_s22 }
  0x10   :  { %s282_s23 = scalar_lea.vmem %s18_s20, 64  ;;  %p287_p6 = scmp.lt.s32.totalorder %s18_s20, %s18_s20 }
  0x11   :  { %p283_p5 = scmp.ne.s32.totalorder %s18_s20, %s282_s23  ;;  %p288_p7 = scmp.lt.s32.totalorder %s282_s23, %s282_s23 }
  0x13   :  { %p289_p8 = por %p288_p7, %p287_p6 }
  0x15   :  { %p290_p9 = pnand %p289_p8, %p283_p5 }
  0x17   :  { %293 = shalt.err (!%p290_p9)
}
  0x18   :  { %20 = dma.hbm_to_vmem [thread:$0]  %s381_s0, 64, %s18_s20, [#allocation3]  }
  0x19   :  { %s302_s26 = scalar_lea.vmem %s40_s22, 128  ;;  %p307_p11 = scmp.lt.s32.totalorder %s40_s22, %s40_s22 }
  0x1a   :  { %p303_p10 = scmp.ne.s32.totalorder %s40_s22, %s302_s26  ;;  %p308_p12 = scmp.lt.s32.totalorder %s302_s26, %s302_s26 }
  0x1c   :  { %p309_p13 = por %p308_p12, %p307_p11 }
  0x1e   :  { %p310_p0 = pnand %p309_p13, %p303_p10 }
  0x20   :  { %313 = shalt.err (!%p310_p0)
}
  0x21   :  { %42 = dma.hbm_to_vmem [thread:$0]  %s383_s2, 128, %s40_s22, [#allocation6]  }
  0x22   :  { %334 = dma.done.wait [#allocation3], 64  }
  0x23   :  { %335 = vsyncadd [#allocation3], 4294967232 }
  0x24   :  { %336 = dma.done.wait [#allocation6], 640  }
  0x25   :  { %337 = vsyncadd [#allocation6], 4294966656  ;;  %v345_v0 = vmov 0   ;;  %v242_v1 = vld [vmem:[#allocation5 + $0x14] ss:$8 sps:$4 sm:$0xff]   ;;  %vm78_vm0 = vcmask 261120  }
  0x26   :  { %114 = vmatprep.mubr.bf16.mxu0 %v345_v0  ;;  %v244_v2 = vld [vmem:[#allocation5 + $0x10] ss:$8 sps:$4 sm:$0xff]   ;;  %94 = vmatprep.subr.bf16.mxu0 %v242_v1  ;;  %v245_v3 = vld [vmem:[#allocation5 + $0x4] ss:$8 sps:$4 sm:$0xff]   ;;  %v247_v4 = vld [vmem:[#allocation5] ss:$8 sps:$4 sm:$0xff]  }
  0x27   :  { %95 = vmatpush1.bf16.msra.mxu0 %v244_v2  ;;  %v53_v5 = vld [vmem:[#allocation2] sm:$0xf]  ;;  %v346_v6 = vmov 0.0   ;;  %vm347_vm1 = vmmov 0   ;;  %v131_v17 = vld [vmem:[#allocation7] sm:$0xff]  ;;  %s348_s0 = smov [#allocation8]  }
  0x28   :  { %96 = vmatprep.subr.bf16.mxu0 %v245_v3  ;;  %228 = vmatprep.subr.mxu1 %v346_v6  ;;  %s210_s2 = sshll.u32 %s348_s0, 4  ;;  %vm202_vm2 = vcmask 57344   ;;  %s211_s2 = int_to_ptr.vmem [resolvable:$true] %s210_s2 }
  0x29   :  { %230 = vmatprep.mubr.msk.f32.mxu1 %vm347_vm1, %v346_v6  ;;  %s314_s28 = scalar_lea.vmem %s211_s2, 16  ;;  %s318_s29 = scalar_lea.vmem %s211_s2, 32 }
  0x2a   :  { %p315_p1 = scmp.ne.s32.totalorder %s211_s2, %s314_s28  ;;  %p319_p2 = scmp.lt.s32.totalorder %s211_s2, %s211_s2 }
  0x2b   :  { %97 = vmatpush1.bf16.msra.mxu0 %v247_v4  ;;  %p320_p3 = scmp.lt.s32.totalorder %s318_s29, %s314_s28 }
  0x2d   :  { %p321_p4 = por %p320_p3, %p319_p2 }
  0x2e   :  { %224 = vmatmul.mubr.msk.bf16.vlgmr.msra.gmra.mxu0 %vm78_vm0, %v53_v5 }
  0x2f   :  { %p322_p5 = pnand %p321_p4, %p315_p1 }
  0xee   :  { %v116_v7 = vpop.f32.mrf.mxu0 }
  0xf0   :  { %v118_v8 = vpop.f32.mrf.mxu0 }
  0xf1   :  { %v225_v9 = vmul.f32 -1.442695, %v118_v8 }
  0xf2   :  { %v120_v10 = vpop.f32.mrf.mxu0 }
  0xf3   :  { %248 = vpow2.f32 %v225_v9 }
  0xf4   :  { %v121_v11 = vpop.f32.mrf.mxu0  ;;  %250 = vtanh.f32 %v116_v7 }
 0x100   :  { %v249_v12 = vpop.eup %248 }
 0x101   :  { %v127_v13 = vadd.f32 1.0, %v249_v12  ;;  %v251_v14 = vpop.eup %250 }
 0x103   :  { %252 = vrcp.f32 %v127_v13 }
 0x110   :  { %v253_v15 = vpop.eup %252 }
 0x111   :  { %v130_v16 = vmul.f32 %v253_v15, %v251_v14 }
 0x113   :  { %229 = vmatpush3.xpose.msra.mxu1 %v130_v16 }
 0x116   :  { %231 = vmatmul.mubr.f32.vlgmr.msra.gmra.mxu1 %v131_v17 }
 0x1d6   :  { %v198_v18 = vpop.f32.mrf.mxu1 }
 0x1d7   :  { %203 = vst.msk [vmem:[#allocation8] sm:$0x1] %vm202_vm2, %v198_v18 }
 0x1d8   :  { %v232_v19 = vpop.f32.mrf.mxu1 }
 0x1d9   :  { %325 = shalt.err (!%p322_p5)
}
 0x1da   :  { %213 = dma.vmem_to_hbm [thread:$0]  %s211_s2, 16, %s384_s3, [#allocation4]  }
 0x1db   :  { %338 = dma.done.wait [#allocation4], 16  }
 0x1dc   :  { %339 = vsyncadd [#allocation4], 4294967280 }
 0x1dd   :  { %217 = vsyncpa [#allocation3], 1 }
 0x1de   :  { %218 = vsyncpa [#allocation6], 1 }
 0x1df   :  { %219 = vsyncpa [#allocation4], 1 }

// kernel: tpu_custom_call.1
= control target key start
LH: loop header
LB: loop body
LE: loop exit
PB: predicated region body
PF: predicated region fallthrough
CT: control target
= control target key end

     0   :  { %8 = vsyncpa [#allocation3], 0  ;;  %s381_s0 = inlined_call_operand.hbm [shape: bf16[8,32], index: 0, kind: input, shape index: {}]   ;;  %s382_s1 = inlined_call_operand.hbm [shape: bf16[32,256], index: 1, kind: input, shape index: {}]   ;;  %s383_s2 = inlined_call_operand.hbm [shape: f32[8,128], index: 2, kind: input, shape index: {}]   ;;  %s384_s3 = inlined_call_operand.hbm [shape: f32[1,8], index: 3, kind: output, shape index: {}]  }
   0x1   :  { %9 = vsyncpa [#allocation6], 0 }
   0x2   :  { %10 = vsyncpa [#allocation4], 0  ;;  %s340_s12 = smov [#allocation5]  }
   0x3   :  { %s26_s13 = sshll.u32 %s340_s12, 4  ;;  %s27_s13 = int_to_ptr.vmem [resolvable:$true] %s26_s13 }
   0x4   :  { %s262_s14 = scalar_lea.vmem %s27_s13, 512  ;;  %p267_p1 = scmp.lt.s32.totalorder %s27_s13, %s27_s13 }
   0x5   :  { %p263_p0 = scmp.ne.s32.totalorder %s27_s13, %s262_s14  ;;  %p268_p2 = scmp.lt.s32.totalorder %s262_s14, %s262_s14 }
   0x7   :  { %p269_p3 = por %p268_p2, %p267_p1 }
   0x9   :  { %p270_p4 = pnand %p269_p3, %p263_p0 }
   0xb   :  { %273 = shalt.err (!%p270_p4)
}
   0xc   :  { %s341_s15 = smov 128   ;;  %s342_s16 = smov 8  }
   0xd   :  { %32 = dma.hbm_to_vmem [thread:$0]  %s382_s1, 512, %s27_s13, [#allocation6], %s341_s15, %s341_s15, %s342_s16  }
   0xe   :  { %s343_s19 = smov [#allocation2]   ;;  %s344_s21 = smov [#allocation7]  }
   0xf   :  { %s17_s20 = sshll.u32 %s343_s19, 4  ;;  %s39_s22 = sshll.u32 %s344_s21, 4  ;;  %s18_s20 = int_to_ptr.vmem [resolvable:$true] %s17_s20  ;;  %s40_s22 = int_to_ptr.vmem [resolvable:$true] %s39_s22 }
  0x10   :  { %s282_s23 = scalar_lea.vmem %s18_s20, 64  ;;  %p287_p6 = scmp.lt.s32.totalorder %s18_s20, %s18_s20 }
  0x11   :  { %p283_p5 = scmp.ne.s32.totalorder %s18_s20, %s282_s23  ;;  %p288_p7 = scmp.lt.s32.totalorder %s282_s23, %s282_s23 }
  0x13   :  { %p289_p8 = por %p288_p7, %p287_p6 }
  0x15   :  { %p290_p9 = pnand %p289_p8, %p283_p5 }
  0x17   :  { %293 = shalt.err (!%p290_p9)
}
  0x18   :  { %20 = dma.hbm_to_vmem [thread:$0]  %s381_s0, 64, %s18_s20, [#allocation3]  }
  0x19   :  { %s302_s26 = scalar_lea.vmem %s40_s22, 128  ;;  %p307_p11 = scmp.lt.s32.totalorder %s40_s22, %s40_s22 }
  0x1a   :  { %p303_p10 = scmp.ne.s32.totalorder %s40_s22, %s302_s26  ;;  %p308_p12 = scmp.lt.s32.totalorder %s302_s26, %s302_s26 }
  0x1c   :  { %p309_p13 = por %p308_p12, %p307_p11 }
  0x1e   :  { %p310_p0 = pnand %p309_p13, %p303_p10 }
  0x20   :  { %313 = shalt.err (!%p310_p0)
}
  0x21   :  { %42 = dma.hbm_to_vmem [thread:$0]  %s383_s2, 128, %s40_s22, [#allocation6]  }
  0x22   :  { %334 = dma.done.wait [#allocation3], 64  }
  0x23   :  { %335 = vsyncadd [#allocation3], 4294967232 }
  0x24   :  { %336 = dma.done.wait [#allocation6], 640  }
  0x25   :  { %337 = vsyncadd [#allocation6], 4294966656  ;;  %v345_v0 = vmov 0   ;;  %v242_v1 = vld [vmem:[#allocation5 + $0x14] ss:$8 sps:$4 sm:$0xff]   ;;  %vm78_vm0 = vcmask 261120  }
  0x26   :  { %114 = vmatprep.mubr.bf16.mxu0 %v345_v0  ;;  %v244_v2 = vld [vmem:[#allocation5 + $0x10] ss:$8 sps:$4 sm:$0xff]   ;;  %94 = vmatprep.subr.bf16.mxu0 %v242_v1  ;;  %v245_v3 = vld [vmem:[#allocation5 + $0x4] ss:$8 sps:$4 sm:$0xff]   ;;  %v247_v4 = vld [vmem:[#allocation5] ss:$8 sps:$4 sm:$0xff]  }
  0x27   :  { %95 = vmatpush1.bf16.msra.mxu0 %v244_v2  ;;  %v53_v5 = vld [vmem:[#allocation2] sm:$0xf]  ;;  %v346_v6 = vmov 0.0   ;;  %vm347_vm1 = vmmov 0   ;;  %v131_v17 = vld [vmem:[#allocation7] sm:$0xff]  ;;  %s348_s0 = smov [#allocation8]  }
  0x28   :  { %96 = vmatprep.subr.bf16.mxu0 %v245_v3  ;;  %228 = vmatprep.subr.mxu1 %v346_v6  ;;  %s210_s2 = sshll.u32 %s348_s0, 4  ;;  %vm202_vm2 = vcmask 57344   ;;  %s211_s2 = int_to_ptr.vmem [resolvable:$true] %s210_s2 }
  0x29   :  { %230 = vmatprep.mubr.msk.f32.mxu1 %vm347_vm1, %v346_v6  ;;  %s314_s28 = scalar_lea.vmem %s211_s2, 16  ;;  %s318_s29 = scalar_lea.vmem %s211_s2, 32 }
  0x2a   :  { %p315_p1 = scmp.ne.s32.totalorder %s211_s2, %s314_s28  ;;  %p319_p2 = scmp.lt.s32.totalorder %s211_s2, %s211_s2 }
  0x2b   :  { %97 = vmatpush1.bf16.msra.mxu0 %v247_v4  ;;  %p320_p3 = scmp.lt.s32.totalorder %s318_s29, %s314_s28 }
  0x2d   :  { %p321_p4 = por %p320_p3, %p319_p2 }
  0x2e   :  { %224 = vmatmul.mubr.msk.bf16.vlgmr.msra.gmra.mxu0 %vm78_vm0, %v53_v5 }
  0x2f   :  { %p322_p5 = pnand %p321_p4, %p315_p1 }
  0xee   :  { %v116_v7 = vpop.f32.mrf.mxu0 }
  0xf0   :  { %v118_v8 = vpop.f32.mrf.mxu0 }
  0xf1   :  { %v225_v9 = vmul.f32 -1.442695, %v118_v8 }
  0xf2   :  { %v120_v10 = vpop.f32.mrf.mxu0 }
  0xf3   :  { %248 = vpow2.f32 %v225_v9 }
  0xf4   :  { %v121_v11 = vpop.f32.mrf.mxu0  ;;  %250 = vtanh.f32 %v116_v7 }
 0x100   :  { %v249_v12 = vpop.eup %248 }
 0x101   :  { %v127_v13 = vadd.f32 1.0, %v249_v12  ;;  %v251_v14 = vpop.eup %250 }
 0x103   :  { %252 = vrcp.f32 %v127_v13 }
 0x110   :  { %v253_v15 = vpop.eup %252 }
 0x111   :  { %v130_v16 = vmul.f32 %v253_v15, %v251_v14 }
 0x113   :  { %229 = vmatpush3.xpose.msra.mxu1 %v130_v16 }
 0x116   :  { %231 = vmatmul.mubr.f32.vlgmr.msra.gmra.mxu1 %v131_v17 }
 0x1d6   :  { %v198_v18 = vpop.f32.mrf.mxu1 }
 0x1d7   :  { %203 = vst.msk [vmem:[#allocation8] sm:$0x1] %vm202_vm2, %v198_v18 }
 0x1d8   :  { %v232_v19 = vpop.f32.mrf.mxu1 }
 0x1d9   :  { %325 = shalt.err (!%p322_p5)
}
 0x1da   :  { %213 = dma.vmem_to_hbm [thread:$0]  %s211_s2, 16, %s384_s3, [#allocation4]  }
 0x1db   :  { %338 = dma.done.wait [#allocation4], 16  }
 0x1dc   :  { %339 = vsyncadd [#allocation4], 4294967280 }
 0x1dd   :  { %217 = vsyncpa [#allocation3], 1 }
 0x1de   :  { %218 = vsyncpa [#allocation6], 1 }
 0x1df   :  { %219 = vsyncpa [#allocation4], 1 }

</bundles_post_ra>
